<compile_context>
chip_gen: v5e
topology: v5e:2x2
jax: 0.10.0
libtpu: 0.0.40
codegen_flags: <defaults>
</compile_context>

<pallas_src>
import functools
from collections import deque

import jax
import jax.numpy as jnp
import numpy as np
from jax.experimental import pallas as pl
from jax.experimental.pallas import tpu as pltpu


def tdl_shift_kernel(line_rev_ref, x_cur_ref, x_tail_ref, out_ref):
    """Writes one (block_t, F) slab of the D-step-delayed output.

    For grid step i covering output rows [i*block_t, (i+1)*block_t):
      rows D..block_t-1  <- current x block rows 0..block_t-D-1   (bulk slab copy)
      rows 0..D-1        <- last D rows of the previous x block   (i > 0)
                            or the reversed initial delay line    (i == 0)
    No carried state, so every grid step is independent ("parallel").
    """
    i = pl.program_id(0)
    block_t = x_cur_ref.shape[0]
    D = x_tail_ref.shape[0]

    # Bulk shifted copy: one unmasked, lane-dense, multi-sublane slab store.
    out_ref[pl.ds(D, block_t - D), :] = x_cur_ref[pl.ds(0, block_t - D), :]

    @pl.when(i == 0)
    def _head_from_initial_line():
        out_ref[pl.ds(0, D), :] = line_rev_ref[...]

    @pl.when(i > 0)
    def _head_from_prev_block_tail():
        out_ref[pl.ds(0, D), :] = x_tail_ref[...]


@functools.partial(jax.jit, static_argnames=("block_t",))
def tdl_sequence(xs, line, block_t=512):
    """Run T TDL steps (push(x_t) then forward()) in one kernel launch.

    xs:   (T, F) inputs, one row per timestep.
    line: (D, F) delay-line state, row 0 = newest tap, row D-1 = oldest tap.
    Returns (outs, new_line); outs[t] is the forward() output at step t.
    """
    T, F = xs.shape
    D, F2 = line.shape
    assert F == F2, "feature dims must match"
    assert D % 8 == 0, "delays must be a multiple of 8 for sublane alignment"
    # TODO(synk): pad D to a multiple of 8 / handle T < D for fully general shapes.
    assert T >= D, "sequence must be at least as long as the delay line"

    # Pick a block size: multiple of D, divides T, capped by the request.
    bt = max(D, min(block_t, T))
    bt -= bt % D
    while bt > D and T % bt != 0:
        bt -= D
    assert bt >= D and bt % D == 0 and T % bt == 0

    # Tiny (D, F) prep: initial line in output order (row D-1 popped first).
    line_rev = jnp.flip(line, axis=0)

    tail_blocks_per_step = bt // D  # x_tail is indexed in units of D rows

    outs = pl.pallas_call(
        tdl_shift_kernel,
        grid=(T // bt,),
        in_specs=[
            # Reversed initial line (tiny, only consumed at grid step 0).
            pl.BlockSpec((D, F), lambda i: (0, 0)),
            # Current (block_t, F) slab of x.
            pl.BlockSpec((bt, F), lambda i: (i, 0)),
            # Last D rows of the *previous* slab of x (block units of D rows).
            pl.BlockSpec(
                (D, F),
                lambda i: (jnp.maximum(i * tail_blocks_per_step - 1, 0), 0),
            ),
        ],
        out_specs=pl.BlockSpec((bt, F), lambda i: (i, 0)),
        out_shape=jax.ShapeDtypeStruct((T, F), xs.dtype),
        compiler_params=pltpu.CompilerParams(
            dimension_semantics=("parallel",)),  # no carried state -> shardable
    )(line_rev, xs, xs)

    # Final state: last D pushed rows, newest first. Tiny separate copy (XLA).
    new_line = jnp.flip(xs[T - D:], axis=0)
    return outs, new_line


def _deque_reference(xs_np, line0_np):
    """Simulate the PyTorch module (push then forward) with a deque."""
    D = line0_np.shape[0]
    ref_line = deque(line0_np[r].copy() for r in range(D))
    ref_outs = []
    for t in range(xs_np.shape[0]):
        ref_line.appendleft(xs_np[t])
        ref_outs.append(np.asarray(ref_line.pop()))
    return np.stack(ref_outs), np.stack(list(ref_line))


if __name__ == "__main__":
    in_features, delays, T, block_t = 128, 8, 2048, 512

    key = jax.random.PRNGKey(0)
    k0, k1 = jax.random.split(key)
    xs = jax.random.normal(k0, (T, in_features), jnp.float32)

    # Case 1: module's actual init (clear() -> all-zero taps).
    line0 = jnp.zeros((delays, in_features), jnp.float32)
    outs, new_line = tdl_sequence(xs, line0, block_t=block_t)
    outs = jax.block_until_ready(outs)
    new_line = jax.block_until_ready(new_line)
    ref_outs, ref_final = _deque_reference(np.asarray(xs), np.asarray(line0))
    np.testing.assert_array_equal(np.asarray(outs), ref_outs)
    np.testing.assert_array_equal(np.asarray(new_line), ref_final)

    # Case 2: non-zero initial line (exercises the i == 0 head path).
    line1 = jax.random.normal(k1, (delays, in_features), jnp.float32)
    outs2, new_line2 = tdl_sequence(xs, line1, block_t=block_t)
    outs2 = jax.block_until_ready(outs2)
    new_line2 = jax.block_until_ready(new_line2)
    ref_outs2, ref_final2 = _deque_reference(np.asarray(xs), np.asarray(line1))
    np.testing.assert_array_equal(np.asarray(outs2), ref_outs2)
    np.testing.assert_array_equal(np.asarray(new_line2), ref_final2)

    print("KERNEL_OK")
</pallas_src>

<mosaic_0001>
module attributes {stable_mosaic.version = 11 : i64} {
  func.func @tdl_shift_kernel(%arg0: i32, %arg1: memref<8x128xf32, #tpu.memory_space<vmem>>, %arg2: memref<512x128xf32, #tpu.memory_space<vmem>>, %arg3: memref<8x128xf32, #tpu.memory_space<vmem>>, %arg4: memref<512x128xf32, #tpu.memory_space<vmem>>) attributes {dimension_semantics = [#tpu.dimension_semantics<parallel>], iteration_bounds = array<i64: 4>, scalar_prefetch = 0 : i64, scratch_operands = 0 : i64, tpu.core_type = #tpu.core_type<tc>, window_params = [{pipeline_mode = #tpu.pipeline_mode<synchronous>, transform_indices = @transform_0, window_bounds = array<i64: 8, 128>}, {transform_indices = @transform_1, window_bounds = array<i64: 512, 128>}, {transform_indices = @transform_2, window_bounds = array<i64: 8, 128>}, {transform_indices = @transform_3, window_bounds = array<i64: 512, 128>}]} {
    %c0 = arith.constant 0 : index
    %c0_0 = arith.constant 0 : index
    %0 = vector.load %arg2[%c0, %c0_0] : memref<512x128xf32, #tpu.memory_space<vmem>>, vector<504x128xf32>
    %c8 = arith.constant 8 : index
    %c0_1 = arith.constant 0 : index
    %1 = vector.load %arg4[%c8, %c0_1] : memref<512x128xf32, #tpu.memory_space<vmem>>, vector<504x128xf32>
    tpu.vector_store %arg4[%c8, %c0_1], %0 {strides = array<i32>} : memref<512x128xf32, #tpu.memory_space<vmem>>, vector<504x128xf32>,
    %c0_i32 = arith.constant 0 : i32
    %2 = arith.cmpi eq, %arg0, %c0_i32 : i32
    %3 = arith.extui %2 : i1 to i32
    %c0_i32_2 = arith.constant 0 : i32
    %4 = arith.cmpi ne, %3, %c0_i32_2 : i32
    scf.if %4 {
      %c0_5 = arith.constant 0 : index
      %c0_6 = arith.constant 0 : index
      %8 = vector.load %arg1[%c0_5, %c0_6] : memref<8x128xf32, #tpu.memory_space<vmem>>, vector<8x128xf32>
      %c0_7 = arith.constant 0 : index
      %c0_8 = arith.constant 0 : index
      %9 = vector.load %arg4[%c0_7, %c0_8] : memref<512x128xf32, #tpu.memory_space<vmem>>, vector<8x128xf32>
      tpu.vector_store %arg4[%c0_7, %c0_8], %8 {strides = array<i32>} : memref<512x128xf32, #tpu.memory_space<vmem>>, vector<8x128xf32>,
    } else {
    }
    %c0_i32_3 = arith.constant 0 : i32
    %5 = arith.cmpi sgt, %arg0, %c0_i32_3 : i32
    %6 = arith.extui %5 : i1 to i32
    %c0_i32_4 = arith.constant 0 : i32
    %7 = arith.cmpi ne, %6, %c0_i32_4 : i32
    scf.if %7 {
      %c0_5 = arith.constant 0 : index
      %c0_6 = arith.constant 0 : index
      %8 = vector.load %arg3[%c0_5, %c0_6] : memref<8x128xf32, #tpu.memory_space<vmem>>, vector<8x128xf32>
      %c0_7 = arith.constant 0 : index
      %c0_8 = arith.constant 0 : index
      %9 = vector.load %arg4[%c0_7, %c0_8] : memref<512x128xf32, #tpu.memory_space<vmem>>, vector<8x128xf32>
      tpu.vector_store %arg4[%c0_7, %c0_8], %8 {strides = array<i32>} : memref<512x128xf32, #tpu.memory_space<vmem>>, vector<8x128xf32>,
    } else {
    }
    return
  }
  func.func @transform_0(%arg0: i32) -> (i32, i32) {
    %c0_i32 = arith.constant 0 : i32
    %c0_i32_0 = arith.constant 0 : i32
    %c0_i32_1 = arith.constant 0 : i32
    return %c0_i32, %c0_i32_0 : i32, i32
  }
  func.func @transform_1(%arg0: i32) -> (i32, i32) {
    %c0_i32 = arith.constant 0 : i32
    %c0_i32_0 = arith.constant 0 : i32
    return %arg0, %c0_i32 : i32, i32
  }
  func.func @transform_2(%arg0: i32) -> (i32, i32) {
    %c64_i32 = arith.constant 64 : i32
    %0 = arith.muli %arg0, %c64_i32 : i32
    %c1_i32 = arith.constant 1 : i32
    %1 = arith.subi %0, %c1_i32 : i32
    %c0_i32 = arith.constant 0 : i32
    %2 = arith.maxsi %1, %c0_i32 : i32
    %c0_i32_0 = arith.constant 0 : i32
    %c0_i32_1 = arith.constant 0 : i32
    return %2, %c0_i32_0 : i32, i32
  }
  func.func @transform_3(%arg0: i32) -> (i32, i32) {
    %c0_i32 = arith.constant 0 : i32
    %c0_i32_0 = arith.constant 0 : i32
    return %arg0, %c0_i32 : i32, i32
  }
}

</mosaic_0001>

<bundles_post_ra>
// kernel: tdl_sequence.1
= control target key start
LH: loop header
LB: loop body
LE: loop exit
PB: predicated region body
PF: predicated region fallthrough
CT: control target
= control target key end

     0   :  { %s1138_s0 = inlined_call_operand.vmem [shape: f32[8,128], index: 0, kind: input, shape index: {}]   ;;  %s1139_s1 = inlined_call_operand.hbm [shape: f32[2048,128], index: 1, kind: input, shape index: {}, may-alias: {1,2}]   ;;  %s1140_s2 = inlined_call_operand.hbm [shape: f32[2048,128], index: 2, kind: input, shape index: {}, may-alias: {1,2}]   ;;  %s1141_s3 = inlined_call_operand.hbm [shape: f32[2048,128], index: 3, kind: output, shape index: {}]  }
   0x1   :  { %1143 = sst [smem:[#allocation12_spill]] %s1139_s1 }
   0x2   :  { %8 = vsyncpa [#allocation3], 0 }
   0x3   :  { %10 = vsyncpa [#allocation3 + $0x1], 0 }
   0x4   :  { %11 = vsyncpa [#allocation6], 0 }
   0x5   :  { %13 = vsyncpa [#allocation6 + $0x1], 0 }
   0x6   :  { %14 = vsyncpa [#allocation4], 0 }
   0x7   :  { %16 = vsyncpa [#allocation4 + $0x1], 0  ;;  %s786_s12 = smov 0   ;;  %s788_s13 = smov 0  }
   0x8   :  { %s790_s14 = smov 0   ;;  %s792_s15 = smov 0  }
   0x9   :  { %s794_s16 = smov 0   ;;  %s796_s17 = smov 0  }
   0xa   :  { %s798_s18 = smov 0  }
   0xb LB: > { %s498_s19 = sadd.s32 4294967294, %s760_s18   ;;  %s823_s20 = sadd.s32 1, %s760_s18   ;;  %s760_s18 = sphi %s798_s18, %s1163_s18   ;;  %s756_s17 = sphi %s796_s17, %s1162_s17   ;;  %s752_s16 = sphi %s794_s16, %s1161_s16   ;;  %s748_s15 = sphi %s792_s15, %s1160_s15   ;;  %s744_s14 = sphi %s790_s14, %s1159_s14   ;;  %s740_s13 = sphi %s788_s13, %s1158_s13   ;;  %s736_s12 = sphi %s786_s12, %s1157_s12  }
   0xc   : > { %s47_s21 = ssub.s32 %s760_s18, %s823_s20  ;;  %s50_s22 = sadd.s32 1, %s756_s17 }
   0xd   : > { %p48_p0 = scmp.eq.s32.totalorder %s47_s21, 0  ;;  %p57_p1 = scmp.ne.s32.totalorder %s756_s17, %s752_s16 }
   0xe   : > { %p58_p2 = scmp.eq.s32.totalorder %s760_s18, 0  ;;  %p63_p3 = scmp.ne.s32.totalorder %s752_s16, %s748_s15 }
   0xf   : > { %s834_s23 = scalar_select %p48_p0, %s756_s17, %s50_s22  }
  0x10   : > { %p841_p4 = por %p58_p2, %p57_p1  ;;  %p127_p5 = scmp.eq.s32.totalorder %s498_s19, 3 }
  0x11   : > { %1144 = sst [smem:[#allocation11_spill]] %s834_s23  ;;  %p1142_p6 = scmp.lt.s32.totalorder %s760_s18, 4 }
  0x12   : > { %p849_p7 = por %p127_p5, %p63_p3  ;;  %s150_s26 = sand.u32 1, %s756_s17  }
  0x13   : > { %s505_s27 = sshll.u32 %s150_s26, 9  ;;  %s525_s28 = sshll.u32 %s760_s18, 9 }
  0x14   : > { %s1146_s25 = scalar_select %p849_p7, 1, 0 }
  0x15   : > { %s1147_s1 = sld [smem:[#allocation12_spill]]  ;;  %s154_s5 = scalar_lea.vmem [#allocation2], %s505_s27 }
  0x16   : > { %s162_s6 = sshll.u32 %s154_s5, 4  ;;  %p862_p8 = pnand %p1142_p6, %p841_p4  ;;  %s163_s6 = int_to_ptr.vmem [resolvable:$true] %s162_s6 }
  0x17   : > { %p512_p9 = scmp.ge.s32.totalorder %s760_s18, 1  ;;  %s151_s9 = scalar_lea.sflag [#allocation3], %s150_s26 }
  0x18   : > { %p610_p11 = pneg %p862_p8 }
  0x1b   : > { %s159_s4 = scalar_lea.hbm %s1147_s1, %s525_s28  ;;  %s613_s22 = scalar_lea.hbm %s1147_s1, 2048 }
  0x1c   : > { %s160_s7 = sshll.u32 %s159_s4, 4  ;;  %s161_s7 = int_to_ptr.hbm [resolvable:$true] %s160_s7 }
  0x1d   : > { %s606_s10 = sshra.s32 %s161_s7, 4  ;;  %s607_s10 = int_to_ptr.hbm [resolvable:$true] %s606_s10 }
  0x1e   : > { %s608_s11 = scalar_lea.hbm %s607_s10, 512  ;;  %p614_p0 = scmp.lt.s32.totalorder %s607_s10, %s1147_s1 }
  0x1f   : > { %p609_p10 = scmp.ne.s32.totalorder %s607_s10, %s608_s11  ;;  %p615_p4 = scmp.lt.s32.totalorder %s613_s22, %s608_s11 }
  0x21   : > { %p611_p12 = pnand %p610_p11, %p609_p10  ;;  %p616_p5 = por %p615_p4, %p614_p0 }
  0x23   : > { %p612_p13 = pneg %p611_p12 }
  0x25   : > { %p617_p6 = pnand %p616_p5, %p612_p13 }
  0x27   : > { %620 = shalt.err (!%p617_p6)
}
  0x28   : > { %s762_s26 = smov 128   ;;  %s763_s28 = smov 8  }
  0x29   : > { %536 = dma.hbm_to_vmem [thread:$0]  (!%p862_p8), %s161_s7, 8192, %s163_s6, %s151_s9, %s762_s26, %s762_s26, %s763_s28  }
  0x2a   : > { %p193_p10 = scmp.lt.s32.totalorder %s760_s18, 5  ;;  %s885_s30 = sadd.s32 4294967295, %s760_s18  }
  0x2b   : > { %s499_s4 = sshll.u32 %s760_s18, 6  ;;  %p64_p6 = scmp.eq.s32.totalorder %s885_s30, 0 }
  0x2c   : > { %p880_p11 = pnand %p512_p9, %p193_p10  ;;  %s500_s5 = sadd.s32 4294967295, %s499_s4 }
  0x2d   : > { %p75_p12 = scmp.gt.s32.totalorder %s500_s5, 0  ;;  %s524_s6 = sadd.s32 64, %s499_s4 }
  0x2e   : > { %p892_p8 = por %p64_p6, %p63_p3  ;;  %s502_s8 = sadd.s32 4294967295, %s524_s6 }
  0x2f   : > { %s1165_s5 = smov (!%p75_p12, %s500_s5), 0  ;;  %p79_p9 = scmp.gt.s32.totalorder %s502_s8, 0 }
  0x30   : > { %p91_p13 = scmp.ne.s32.totalorder %s744_s14, %s740_s13  ;;  %p97_p0 = scmp.ne.s32.totalorder %s740_s13, %s736_s12 }
  0x31   : > { %s1167_s8 = smov (!%p79_p9, %s502_s8), 0  ;;  %s84_s9 = sadd.s32 1, %s744_s14 }
  0x32   : > { %p901_p4 = por %p97_p0, %p64_p6  ;;  %s81_s11 = ssub.s32 %s1165_s5, %s1167_s8 }
  0x33   : > { %p121_p5 = scmp.eq.s32.totalorder %s885_s30, 3  ;;  %p82_p10 = scmp.eq.s32.totalorder %s81_s11, 0 }
  0x34   : > { %s172_s19 = sand.u32 1, %s744_s14   ;;  %p93_p3 = por %p91_p13, %p58_p2 }
  0x35   : > { %p912_p7 = por %p121_p5, %p57_p1  ;;  %s508_s12 = sshll.u32 %s172_s19, 3 }
  0x36   : > { %s917_s22 = scalar_select %p82_p10, %s744_s14, %s84_s9  }
  0x37   : > { %s511_s24 = sshll.u32 %s1165_s5, 3  ;;  %s176_s6 = scalar_lea.vmem [#allocation5], %s508_s12 }
  0x38   : > { %s184_s28 = scalar_lea.hbm %s1140_s2, %s511_s24  ;;  %s188_s8 = sshll.u32 %s176_s6, 4  ;;  %s189_s8 = int_to_ptr.vmem [resolvable:$true] %s188_s8 }
  0x39   : > { %s186_s4 = sshll.u32 %s184_s28, 4  ;;  %p1153_p6 = scmp.lt.s32.totalorder %s760_s18, 4  ;;  %s187_s4 = int_to_ptr.hbm [resolvable:$true] %s186_s4 }
  0x3a   : > { %s173_s1 = scalar_lea.sflag [#allocation6], %s172_s19  ;;  %s636_s9 = sshra.s32 %s187_s4, 4  ;;  %s637_s9 = int_to_ptr.hbm [resolvable:$true] %s636_s9 }
  0x3b   : > { %p924_p2 = pnand %p1153_p6, %p93_p3  ;;  %s638_s23 = scalar_lea.hbm %s637_s9, 8 }
  0x3c   : > { %p639_p1 = scmp.ne.s32.totalorder %s637_s9, %s638_s23  ;;  %s643_s24 = scalar_lea.hbm %s1140_s2, 2048 }
  0x3d   : > { %p640_p12 = pneg %p924_p2  ;;  %p644_p0 = scmp.lt.s32.totalorder %s637_s9, %s1140_s2 }
  0x3e   : > { %p645_p5 = scmp.lt.s32.totalorder %s643_s24, %s638_s23 }
  0x3f   : > { %p641_p9 = pnand %p640_p12, %p639_p1 }
  0x40   : > { %p646_p10 = por %p645_p5, %p644_p0 }
  0x41   : > { %p642_p13 = pneg %p641_p9 }
  0x43   : > { %p647_p3 = pnand %p646_p10, %p642_p13 }
  0x45   : > { %650 = shalt.err (!%p647_p3)
}
  0x46   : > { %539 = dma.hbm_to_vmem [thread:$0]  (!%p924_p2), %s187_s4, 128, %s189_s8, %s173_s1  }
  0x47   : > { %197 = sbr.rel (%p880_p11) target bundleno = 172 (0xac), region = 32  ;;  %s941_s19 = sand.u32 (!%p880_p11), 1, %s752_s16  }
  0x48   : > { %s513_s28 = sshll.u32 (!%p880_p11), %s941_s19, 9  ;;  %s200_s6 = scalar_lea.sflag (!%p880_p11), [#allocation3], %s941_s19 }
  0x49   : > { %s945_s5 = scalar_lea.vmem (!%p880_p11), [#allocation2], %s513_s28 }
  0x4c   : > { %723 = dma.done.wait (%p892_p8), %s200_s6, 8192  }
  0x4d   : > { %725 = vsyncadd (%p892_p8), %s200_s6, 4294959104  ;;  %s209_s1 = sand.u32 1, %s740_s13  }
  0x4e   : > { %s952_s23 = sshll.u32 %s209_s1, 3  ;;  %s210_s29 = scalar_lea.sflag [#allocation6], %s209_s1 }
  0x4f   : > { %s213_s4 = scalar_lea.vmem [#allocation5], %s952_s23 }
  0x50   : > { %727 = dma.done.wait (%p901_p4), %s210_s29, 128  }
  0x51   : > { %729 = vsyncadd (%p901_p4), %s210_s29, 4294967168  ;;  %v248_v0 = vld [vmem:[%s945_s5] sm:$0xff]  ;;  %v249_v1 = vld [vmem:[%s945_s5 + $0x8] sm:$0xff]  ;;  %s962_s7 = scalar_lea.vmem [#allocation7], %s513_s28  ;;  %p516_p11 = scmp.ne.s32.totalorder %s885_s30, 0 }
  0x52   : > { %v250_v2 = vld [vmem:[%s945_s5 + $0x10] sm:$0xff]  ;;  %311 = vst [vmem:[%s962_s7 + $0x8] sm:$0xff] %v248_v0  ;;  %v251_v3 = vld [vmem:[%s945_s5 + $0x18] sm:$0xff]  ;;  %v252_v4 = vld [vmem:[%s945_s5 + $0x20] sm:$0xff] }
  0x53   : > { %312 = vst [vmem:[%s962_s7 + $0x10] sm:$0xff] %v249_v1  ;;  %v253_v5 = vld [vmem:[%s945_s5 + $0x28] sm:$0xff]  ;;  %v254_v6 = vld [vmem:[%s945_s5 + $0x30] sm:$0xff]  ;;  %v255_v7 = vld [vmem:[%s945_s5 + $0x38] sm:$0xff] }
  0x54   : > { %313 = vst [vmem:[%s962_s7 + $0x18] sm:$0xff] %v250_v2  ;;  %v256_v8 = vld [vmem:[%s945_s5 + $0x40] sm:$0xff]  ;;  %v257_v9 = vld [vmem:[%s945_s5 + $0x48] sm:$0xff]  ;;  %v258_v10 = vld [vmem:[%s945_s5 + $0x50] sm:$0xff] }
  0x55   : > { %314 = vst [vmem:[%s962_s7 + $0x20] sm:$0xff] %v251_v3  ;;  %v259_v11 = vld [vmem:[%s945_s5 + $0x58] sm:$0xff]  ;;  %v260_v12 = vld [vmem:[%s945_s5 + $0x60] sm:$0xff]  ;;  %v261_v13 = vld [vmem:[%s945_s5 + $0x68] sm:$0xff] }
  0x56   : > { %315 = vst [vmem:[%s962_s7 + $0x28] sm:$0xff] %v252_v4  ;;  %v262_v14 = vld [vmem:[%s945_s5 + $0x70] sm:$0xff]  ;;  %v263_v15 = vld [vmem:[%s945_s5 + $0x78] sm:$0xff]  ;;  %v264_v16 = vld [vmem:[%s945_s5 + $0x80] sm:$0xff] }
  0x57   : > { %316 = vst [vmem:[%s962_s7 + $0x30] sm:$0xff] %v253_v5  ;;  %v265_v17 = vld [vmem:[%s945_s5 + $0x88] sm:$0xff]  ;;  %v266_v18 = vld [vmem:[%s945_s5 + $0x90] sm:$0xff]  ;;  %v267_v19 = vld [vmem:[%s945_s5 + $0x98] sm:$0xff] }
  0x58   : > { %317 = vst [vmem:[%s962_s7 + $0x38] sm:$0xff] %v254_v6  ;;  %v268_v20 = vld [vmem:[%s945_s5 + $0xa0] sm:$0xff]  ;;  %v269_v21 = vld [vmem:[%s945_s5 + $0xa8] sm:$0xff]  ;;  %v270_v22 = vld [vmem:[%s945_s5 + $0xb0] sm:$0xff] }
  0x59   : > { %318 = vst [vmem:[%s962_s7 + $0x40] sm:$0xff] %v255_v7  ;;  %v271_v23 = vld [vmem:[%s945_s5 + $0xb8] sm:$0xff]  ;;  %v272_v24 = vld [vmem:[%s945_s5 + $0xc0] sm:$0xff]  ;;  %v273_v25 = vld [vmem:[%s945_s5 + $0xc8] sm:$0xff] }
  0x5a   : > { %319 = vst [vmem:[%s962_s7 + $0x48] sm:$0xff] %v256_v8  ;;  %v274_v26 = vld [vmem:[%s945_s5 + $0xd0] sm:$0xff]  ;;  %v275_v27 = vld [vmem:[%s945_s5 + $0xd8] sm:$0xff]  ;;  %v276_v28 = vld [vmem:[%s945_s5 + $0xe0] sm:$0xff] }
  0x5b   : > { %320 = vst [vmem:[%s962_s7 + $0x50] sm:$0xff] %v257_v9  ;;  %v277_v29 = vld [vmem:[%s945_s5 + $0xe8] sm:$0xff]  ;;  %v278_v30 = vld [vmem:[%s945_s5 + $0xf0] sm:$0xff]  ;;  %v279_v31 = vld [vmem:[%s945_s5 + $0xf8] sm:$0xff] }
  0x5c   : > { %321 = vst [vmem:[%s962_s7 + $0x58] sm:$0xff] %v258_v10  ;;  %v280_v32 = vld [vmem:[%s945_s5 + $0x100] sm:$0xff]  ;;  %v281_v33 = vld [vmem:[%s945_s5 + $0x108] sm:$0xff]  ;;  %v282_v34 = vld [vmem:[%s945_s5 + $0x110] sm:$0xff] }
  0x5d   : > { %322 = vst [vmem:[%s962_s7 + $0x60] sm:$0xff] %v259_v11  ;;  %v283_v35 = vld [vmem:[%s945_s5 + $0x118] sm:$0xff]  ;;  %v284_v36 = vld [vmem:[%s945_s5 + $0x120] sm:$0xff]  ;;  %v285_v37 = vld [vmem:[%s945_s5 + $0x128] sm:$0xff] }
  0x5e   : > { %323 = vst [vmem:[%s962_s7 + $0x68] sm:$0xff] %v260_v12  ;;  %v286_v38 = vld [vmem:[%s945_s5 + $0x130] sm:$0xff]  ;;  %v287_v39 = vld [vmem:[%s945_s5 + $0x138] sm:$0xff]  ;;  %v288_v40 = vld [vmem:[%s945_s5 + $0x140] sm:$0xff] }
  0x5f   : > { %324 = vst [vmem:[%s962_s7 + $0x70] sm:$0xff] %v261_v13  ;;  %v289_v41 = vld [vmem:[%s945_s5 + $0x148] sm:$0xff]  ;;  %v290_v42 = vld [vmem:[%s945_s5 + $0x150] sm:$0xff]  ;;  %v291_v43 = vld [vmem:[%s945_s5 + $0x158] sm:$0xff] }
  0x60   : > { %325 = vst [vmem:[%s962_s7 + $0x78] sm:$0xff] %v262_v14  ;;  %v292_v44 = vld [vmem:[%s945_s5 + $0x160] sm:$0xff]  ;;  %v293_v45 = vld [vmem:[%s945_s5 + $0x168] sm:$0xff]  ;;  %v294_v46 = vld [vmem:[%s945_s5 + $0x170] sm:$0xff] }
  0x61   : > { %326 = vst [vmem:[%s962_s7 + $0x80] sm:$0xff] %v263_v15  ;;  %v295_v47 = vld [vmem:[%s945_s5 + $0x178] sm:$0xff]  ;;  %v296_v48 = vld [vmem:[%s945_s5 + $0x180] sm:$0xff]  ;;  %v297_v49 = vld [vmem:[%s945_s5 + $0x188] sm:$0xff] }
  0x62   : > { %327 = vst [vmem:[%s962_s7 + $0x88] sm:$0xff] %v264_v16  ;;  %v298_v50 = vld [vmem:[%s945_s5 + $0x190] sm:$0xff]  ;;  %v299_v51 = vld [vmem:[%s945_s5 + $0x198] sm:$0xff]  ;;  %v300_v52 = vld [vmem:[%s945_s5 + $0x1a0] sm:$0xff] }
  0x63   : > { %328 = vst [vmem:[%s962_s7 + $0x90] sm:$0xff] %v265_v17  ;;  %v301_v53 = vld [vmem:[%s945_s5 + $0x1a8] sm:$0xff]  ;;  %v302_v54 = vld [vmem:[%s945_s5 + $0x1b0] sm:$0xff]  ;;  %v303_v55 = vld [vmem:[%s945_s5 + $0x1b8] sm:$0xff] }
  0x64   : > { %329 = vst [vmem:[%s962_s7 + $0x98] sm:$0xff] %v266_v18  ;;  %v304_v56 = vld [vmem:[%s945_s5 + $0x1c0] sm:$0xff]  ;;  %v305_v57 = vld [vmem:[%s945_s5 + $0x1c8] sm:$0xff]  ;;  %v306_v58 = vld [vmem:[%s945_s5 + $0x1d0] sm:$0xff] }
  0x65   : > { %330 = vst [vmem:[%s962_s7 + $0xa0] sm:$0xff] %v267_v19  ;;  %v307_v59 = vld [vmem:[%s945_s5 + $0x1d8] sm:$0xff]  ;;  %v308_v60 = vld [vmem:[%s945_s5 + $0x1e0] sm:$0xff]  ;;  %v309_v61 = vld [vmem:[%s945_s5 + $0x1e8] sm:$0xff] }
  0x66   : > { %331 = vst [vmem:[%s962_s7 + $0xa8] sm:$0xff] %v268_v20  ;;  %v310_v62 = vld [vmem:[%s945_s5 + $0x1f0] sm:$0xff] }
  0x67   : > { %332 = vst [vmem:[%s962_s7 + $0xb0] sm:$0xff] %v269_v21 }
  0x68   : > { %333 = vst [vmem:[%s962_s7 + $0xb8] sm:$0xff] %v270_v22 }
  0x69   : > { %334 = vst [vmem:[%s962_s7 + $0xc0] sm:$0xff] %v271_v23 }
  0x6a   : > { %335 = vst [vmem:[%s962_s7 + $0xc8] sm:$0xff] %v272_v24 }
  0x6b   : > { %336 = vst [vmem:[%s962_s7 + $0xd0] sm:$0xff] %v273_v25 }
  0x6c   : > { %337 = vst [vmem:[%s962_s7 + $0xd8] sm:$0xff] %v274_v26 }
  0x6d   : > { %338 = vst [vmem:[%s962_s7 + $0xe0] sm:$0xff] %v275_v27 }
  0x6e   : > { %339 = vst [vmem:[%s962_s7 + $0xe8] sm:$0xff] %v276_v28 }
  0x6f   : > { %340 = vst [vmem:[%s962_s7 + $0xf0] sm:$0xff] %v277_v29 }
  0x70   : > { %341 = vst [vmem:[%s962_s7 + $0xf8] sm:$0xff] %v278_v30 }
  0x71   : > { %342 = vst [vmem:[%s962_s7 + $0x100] sm:$0xff] %v279_v31 }
  0x72   : > { %343 = vst [vmem:[%s962_s7 + $0x108] sm:$0xff] %v280_v32 }
  0x73   : > { %344 = vst [vmem:[%s962_s7 + $0x110] sm:$0xff] %v281_v33 }
  0x74   : > { %345 = vst [vmem:[%s962_s7 + $0x118] sm:$0xff] %v282_v34 }
  0x75   : > { %346 = vst [vmem:[%s962_s7 + $0x120] sm:$0xff] %v283_v35 }
  0x76   : > { %347 = vst [vmem:[%s962_s7 + $0x128] sm:$0xff] %v284_v36 }
  0x77   : > { %348 = vst [vmem:[%s962_s7 + $0x130] sm:$0xff] %v285_v37 }
  0x78   : > { %349 = vst [vmem:[%s962_s7 + $0x138] sm:$0xff] %v286_v38 }
  0x79   : > { %350 = vst [vmem:[%s962_s7 + $0x140] sm:$0xff] %v287_v39 }
  0x7a   : > { %351 = vst [vmem:[%s962_s7 + $0x148] sm:$0xff] %v288_v40 }
  0x7b   : > { %352 = vst [vmem:[%s962_s7 + $0x150] sm:$0xff] %v289_v41 }
  0x7c   : > { %353 = vst [vmem:[%s962_s7 + $0x158] sm:$0xff] %v290_v42 }
  0x7d   : > { %354 = vst [vmem:[%s962_s7 + $0x160] sm:$0xff] %v291_v43 }
  0x7e   : > { %355 = vst [vmem:[%s962_s7 + $0x168] sm:$0xff] %v292_v44 }
  0x7f   : > { %356 = vst [vmem:[%s962_s7 + $0x170] sm:$0xff] %v293_v45 }
  0x80   : > { %357 = vst [vmem:[%s962_s7 + $0x178] sm:$0xff] %v294_v46 }
  0x81   : > { %358 = vst [vmem:[%s962_s7 + $0x180] sm:$0xff] %v295_v47 }
  0x82   : > { %359 = vst [vmem:[%s962_s7 + $0x188] sm:$0xff] %v296_v48 }
  0x83   : > { %360 = vst [vmem:[%s962_s7 + $0x190] sm:$0xff] %v297_v49 }
  0x84   : > { %361 = vst [vmem:[%s962_s7 + $0x198] sm:$0xff] %v298_v50 }
  0x85   : > { %362 = vst [vmem:[%s962_s7 + $0x1a0] sm:$0xff] %v299_v51 }
  0x86   : > { %363 = vst [vmem:[%s962_s7 + $0x1a8] sm:$0xff] %v300_v52 }
  0x87   : > { %364 = vst [vmem:[%s962_s7 + $0x1b0] sm:$0xff] %v301_v53 }
  0x88   : > { %365 = vst [vmem:[%s962_s7 + $0x1b8] sm:$0xff] %v302_v54 }
  0x89   : > { %366 = vst [vmem:[%s962_s7 + $0x1c0] sm:$0xff] %v303_v55 }
  0x8a   : > { %367 = vst [vmem:[%s962_s7 + $0x1c8] sm:$0xff] %v304_v56 }
  0x8b   : > { %368 = vst [vmem:[%s962_s7 + $0x1d0] sm:$0xff] %v305_v57 }
  0x8c   : > { %369 = vst [vmem:[%s962_s7 + $0x1d8] sm:$0xff] %v306_v58  ;;  %377 = sbr.rel (%p516_p11) target bundleno = 147 (0x93), region = 44 }
  0x8d   : > { %370 = vst [vmem:[%s962_s7 + $0x1e0] sm:$0xff] %v307_v59 }
  0x8e   : > { %371 = vst [vmem:[%s962_s7 + $0x1e8] sm:$0xff] %v308_v60 }
  0x8f   : > { %372 = vst [vmem:[%s962_s7 + $0x1f0] sm:$0xff] %v309_v61 }
  0x90   : > { %373 = vst [vmem:[%s962_s7 + $0x1f8] sm:$0xff] %v310_v62 }
  0x91   : > { %v378_v63 = vld [vmem:[%s1138_s0] sm:$0xff] }
  0x92   : > { %379 = vst [vmem:[%s962_s7] sm:$0xff] %v378_v63 }
  0x93 PF: > { %p517_p8 = scmp.le.s32.totalorder %s885_s30, 0 }
  0x95   : > { %383 = sbr.rel (%p517_p8) target bundleno = 156 (0x9c), region = 48 }
  0x9a   : > { %v384_v0 = vld [vmem:[%s213_s4] sm:$0xff] }
  0x9b   : > { %385 = vst [vmem:[%s962_s7] sm:$0xff] %v384_v0 }
  0x9c PF: > { %s526_s11 = sshll.u32 %s885_s30, 9  ;;  %s399_s27 = sshll.u32 %s962_s7, 4  ;;  %s400_s27 = int_to_ptr.vmem [resolvable:$true] %s399_s27 }
  0x9d   : > { %s398_s24 = scalar_lea.hbm %s1141_s3, %s526_s11  ;;  %s387_s28 = scalar_lea.sflag [#allocation4], %s941_s19 }
  0x9e   : > { %s401_s26 = sshll.u32 %s398_s24, 4  ;;  %s686_s30 = scalar_lea.hbm %s1141_s3, 2048  ;;  %s402_s26 = int_to_ptr.hbm [resolvable:$true] %s401_s26 }
  0x9f   : > { %s680_s6 = sshra.s32 %s402_s26, 4  ;;  %s681_s6 = int_to_ptr.hbm [resolvable:$true] %s680_s6 }
  0xa0   : > { %s682_s5 = scalar_lea.hbm %s681_s6, 512  ;;  %p687_p1 = scmp.lt.s32.totalorder %s681_s6, %s1141_s3 }
  0xa1   : > { %p683_p4 = scmp.ne.s32.totalorder %s681_s6, %s682_s5  ;;  %p688_p12 = scmp.lt.s32.totalorder %s686_s30, %s682_s5 }
  0xa3   : > { %p684_p6 = pnand %p683_p4, %p912_p7  ;;  %p689_p9 = por %p688_p12, %p687_p1 }
  0xa5   : > { %p685_p2 = pneg %p684_p6 }
  0xa7   : > { %p690_p13 = pnand %p689_p9, %p685_p2 }
  0xa9   : > { %693 = shalt.err (!%p690_p13)
}
  0xaa   : > { %s764_s19 = smov 128   ;;  %s765_s7 = smov 8  }
  0xab   : > { %531 = dma.vmem_to_hbm [thread:$0]  (%p912_p7), %s400_s27, 8192, %s402_s26, %s387_s28, %s764_s19, %s764_s19, %s765_s7  }
  0xac PF: > { %p545_p0 = scmp.ge.s32.totalorder %s760_s18, 2  ;;  %s416_s10 = sand.u32 1, %s748_s15  }
  0xad   : > { %p1155_p5 = scmp.ne.s32.totalorder %s1146_s25, 0  ;;  %s417_s8 = scalar_lea.sflag [#allocation4], %s416_s10 }
  0xaf   : > { %p541_p10 = pnand %p545_p0, %p1155_p5 }
  0xb1   : > { %p542_p3 = pneg %p541_p10 }
  0xb3   : > { %731 = dma.done.wait (%p542_p3), %s417_s8, 8192  }
  0xb4   : > { %733 = vsyncadd (%p542_p3), %s417_s8, 4294959104  ;;  %s1156_s21 = sld [smem:[#allocation11_spill]]  ;;  %p19_p7 = scmp.ge.s32.totalorder %s823_s20, 6  }
  0xb5   : > { %s1157_s12 = smov %s740_s13  ;;  %s1158_s13 = smov %s744_s14 }
  0xb6   : > { %s1159_s14 = smov %s917_s22  ;;  %s1160_s15 = smov %s752_s16 }
  0xb7   : > { %s1161_s16 = smov %s756_s17  ;;  %s1163_s18 = smov %s823_s20 }
  0xb8   :  { %21 = sbr.rel (!%p19_p7) target bundleno = 11 (0xb), region = 98 }
  0xba   : > { %s1162_s17 = smov %s1156_s21 }
  0xbd   :  { %423 = vsyncpa [#allocation3], 1 }
  0xbe   :  { %425 = vsyncpa [#allocation3 + $0x1], 1 }
  0xbf   :  { %426 = vsyncpa [#allocation6], 1 }
  0xc0   :  { %428 = vsyncpa [#allocation6 + $0x1], 1 }
  0xc1   :  { %429 = vsyncpa [#allocation4], 1 }
  0xc2   :  { %431 = vsyncpa [#allocation4 + $0x1], 1 }

</bundles_post_ra>
